<compile_context>
chip_gen: v7x
topology: tpu7x:2x2x1
jax: 0.10.0
libtpu: 0.0.40
codegen_flags: <defaults>
</compile_context>

<pallas_src>
import math

import jax
import jax.numpy as jnp
import numpy as np
from jax.experimental import pallas as pl
from jax.experimental.pallas import tpu as pltpu


_INV_SQRT2 = 1.0 / math.sqrt(2.0)
_VMEM_BUDGET_BYTES = 40 << 20   # conservative; fits v7x's 64 MiB with margin


def _erf(x):
    """Abramowitz & Stegun 7.1.26 rational approximation of erf.

    Max abs error 1.5e-7 (f32-exact).  abs/mul/add stay on the VPU, the exp
    lands on the otherwise-idle EUP slot.  The divide is kept full-precision:
    pl.reciprocal(approx=True) would add ~1e-4-level error on top of the erf
    fit, and this kernel is MXU/memory-bound, not VALU-bound.
    """
    p = 0.3275911
    a1, a2, a3, a4, a5 = (0.254829592, -0.284496736, 1.421413741,
                          -1.453152027, 1.061405429)
    ax = jnp.abs(x)
    t = 1.0 / (1.0 + p * ax)
    poly = ((((a5 * t + a4) * t + a3) * t + a2) * t + a1) * t
    y = 1.0 - poly * jnp.exp(-ax * ax)
    return jnp.where(x >= 0, y, -y)


def _gelu_exact(x):
    # torch.nn.functional.gelu default ("exact"/erf formulation), in f32.
    return 0.5 * x * (1.0 + _erf(x * _INV_SQRT2))


def cross_mlp_kernel(x_ref, w1_ref, b1_ref, w2_ref, b2_ref, o_ref):
    # fc1: operands stay in their native dtype (bf16-native MXU path when the
    # inputs are bf16); accumulation is f32 via preferred_element_type.
    h = jnp.dot(x_ref[...], w1_ref[...], preferred_element_type=jnp.float32)
    h = _gelu_exact(h + b1_ref[...].astype(jnp.float32))
    # Dropout: identity in eval mode.
    # fc2: cast the hidden activations back to the weight dtype for the MXU.
    y = jnp.dot(h.astype(w2_ref.dtype), w2_ref[...],
                preferred_element_type=jnp.float32)
    y = y + b2_ref[...].astype(jnp.float32)
    o_ref[...] = y.astype(o_ref.dtype)      # one contiguous, lane-dense store


def _round_up(v, m):
    return ((v + m - 1) // m) * m


def _choose_block_m(M, bm_cap):
    """Row-tile size: multiple of 8, dividing M when possible (no x padding),
    and giving >= 2 tiles so the 'parallel' axis shards across v7x's two TCs."""
    bm_cap = max(8, int(bm_cap))
    if M % 8 != 0:
        # Odd row count: one full-extent block if it fits, else padded tiles.
        return M if M <= bm_cap else bm_cap
    target = max(8, min(bm_cap, _round_up(pl.cdiv(M, 2), 8)))
    bm = target
    while bm >= 8 and bm >= target // 2:
        if M % bm == 0:
            return bm
        bm -= 8
    return target   # no nearby divisor: accept one padded ragged last tile


def cross_mlp(x, params, *, block_m=1024):
    """x: (..., embed_size); params = (w1, b1, w2, b2) with weights stored
    (in_features, out_features), i.e. the transpose of torch's Linear.weight."""
    w1, b1, w2, b2 = params
    *lead, E = x.shape
    H1, OUT = w1.shape[1], w2.shape[1]
    assert w1.shape == (E, H1) and w2.shape == (H1, OUT)
    assert b1.shape == (H1,) and b2.shape == (OUT,)

    # Single matmul dtype: a mixed f32 x bf16 dot would force the slow MXU path.
    w1, b1, w2, b2 = (p.astype(x.dtype) for p in (w1, b1, w2, b2))

    # Lane-dense hidden/output: zero-pad H1 and OUT (weights only, never x) to
    # multiples of 128 so MXU tiles are full and output stores are unmasked.
    H1p, OUTp = _round_up(H1, 128), _round_up(OUT, 128)
    if H1p != H1:
        w1 = jnp.pad(w1, ((0, 0), (0, H1p - H1)))
        b1 = jnp.pad(b1, ((0, H1p - H1),))
        w2 = jnp.pad(w2, ((0, H1p - H1), (0, 0)))
    if OUTp != OUT:
        w2 = jnp.pad(w2, ((0, 0), (0, OUTp - OUT)))
        b2 = jnp.pad(b2, ((0, OUTp - OUT),))

    # Fold batch/seq into one row axis so the matmuls fill sublanes.
    M = int(np.prod(lead)) if lead else 1
    x2d = x.reshape(M, E)

    # VMEM budget: double-buffered x/out tiles + single-buffered resident
    # weights + f32 intermediates (bm x H1p and bm x OUTp).
    itm = jnp.dtype(x.dtype).itemsize
    w_bytes = (E * H1p + H1p * OUTp + H1p + OUTp) * itm
    per_row = 2 * E * itm + 2 * OUTp * itm + 4 * (H1p + OUTp)
    bm_cap = min(block_m,
                 max(8, ((_VMEM_BUDGET_BYTES - w_bytes - (2 << 20)) // per_row)
                     // 8 * 8))
    # TODO(synk): if the resident weights alone blow the budget (huge H1*OUT),
    # stream w2 over an extra OUT grid axis instead of holding it resident.
    bm = _choose_block_m(M, bm_cap)
    n_m = pl.cdiv(M, bm)
    Mp = n_m * bm
    if Mp != M:                       # only hit when no divisor-friendly bm exists
        x2d = jnp.pad(x2d, ((0, Mp - M), (0, 0)))

    vmem_limit = int(min(64 << 20, max(2 * (w_bytes + bm * per_row), 16 << 20)))

    resident = dict(pipeline_mode=pl.Buffered(1))   # constant index_map: 1 buffer

    out2d = pl.pallas_call(
        cross_mlp_kernel,
        out_shape=jax.ShapeDtypeStruct((Mp, OUTp), x.dtype),
        grid_spec=pltpu.PrefetchScalarGridSpec(
            num_scalar_prefetch=0,
            grid=(n_m,),
            in_specs=[
                pl.BlockSpec((bm, E), lambda i: (i, 0)),                  # x tiles
                pl.BlockSpec((E, H1p), lambda i: (0, 0), **resident),     # fc1 W
                pl.BlockSpec((1, H1p), lambda i: (0, 0), **resident),     # fc1 b
                pl.BlockSpec((H1p, OUTp), lambda i: (0, 0), **resident),  # fc2 W
                pl.BlockSpec((1, OUTp), lambda i: (0, 0), **resident),    # fc2 b
            ],
            out_specs=pl.BlockSpec((bm, OUTp), lambda i: (i, 0)),
        ),
        compiler_params=pltpu.CompilerParams(
            dimension_semantics=("parallel",),   # row tiles shard across TCs (v7x)
            vmem_limit_bytes=vmem_limit),
    )(x2d, w1, b1.reshape(1, H1p), w2, b2.reshape(1, OUTp))

    return out2d[:M, :OUT].reshape(*lead, OUT)


def reference(x, params):
    """Pure-JAX reference mirroring the PyTorch forward (eval mode)."""
    w1, b1, w2, b2 = params
    h = jax.nn.gelu(x @ w1 + b1, approximate=False)   # exact GELU, torch default
    return h @ w2 + b2


if __name__ == "__main__":
    # Small shapes consistent with the module.
    B, S, E = 2, 8, 32
    ratio = 4
    hidden = E // ratio        # 8
    out_size = 32
    dropout_rate = 0.1         # eval mode -> identity

    key = jax.random.PRNGKey(0)
    k_x, k_w1, k_b1, k_w2, k_b2 = jax.random.split(key, 5)

    def xavier_uniform(k, fan_in, fan_out):
        bound = math.sqrt(6.0 / (fan_in + fan_out))
        return jax.random.uniform(k, (fan_in, fan_out), jnp.float32, -bound, bound)

    x = jax.random.normal(k_x, (B, S, E), jnp.float32)
    w1 = xavier_uniform(k_w1, E, hidden)               # stored (in, out) == torch W.T
    b1 = 1e-6 * jax.random.normal(k_b1, (hidden,), jnp.float32)
    w2 = xavier_uniform(k_w2, hidden, out_size)
    b2 = 1e-6 * jax.random.normal(k_b2, (out_size,), jnp.float32)
    params = (w1, b1, w2, b2)

    out = cross_mlp(x, params)
    jax.block_until_ready(out)

    ref = reference(x, params)
    np.testing.assert_allclose(np.asarray(out), np.asarray(ref),
                               rtol=2e-5, atol=2e-5)

    print("KERNEL_OK")
</pallas_src>

<mosaic_0001>
module attributes {stable_mosaic.version = 11 : i64} {
  func.func @cross_mlp_kernel(%arg0: i32, %arg1: memref<8x32xf32, #tpu.memory_space<vmem>>, %arg2: memref<32x128xf32, #tpu.memory_space<vmem>>, %arg3: memref<1x128xf32, #tpu.memory_space<vmem>>, %arg4: memref<128x128xf32, #tpu.memory_space<vmem>>, %arg5: memref<1x128xf32, #tpu.memory_space<vmem>>, %arg6: memref<8x128xf32, #tpu.memory_space<vmem>>) attributes {dimension_semantics = [#tpu.dimension_semantics<parallel>], iteration_bounds = array<i64: 2>, scalar_prefetch = 0 : i64, scratch_operands = 0 : i64, tpu.core_type = #tpu.core_type<tc>, window_params = [{transform_indices = @transform_0, window_bounds = array<i64: 8, 32>}, {pipeline_mode = #tpu.pipeline_mode<synchronous>, transform_indices = @transform_1, window_bounds = array<i64: 32, 128>}, {pipeline_mode = #tpu.pipeline_mode<synchronous>, transform_indices = @transform_2, window_bounds = array<i64: 1, 128>}, {pipeline_mode = #tpu.pipeline_mode<synchronous>, transform_indices = @transform_3, window_bounds = array<i64: 128, 128>}, {pipeline_mode = #tpu.pipeline_mode<synchronous>, transform_indices = @transform_4, window_bounds = array<i64: 1, 128>}, {transform_indices = @transform_5, window_bounds = array<i64: 8, 128>}]} {
    %c0 = arith.constant 0 : index
    %c0_0 = arith.constant 0 : index
    %0 = vector.load %arg1[%c0, %c0_0] : memref<8x32xf32, #tpu.memory_space<vmem>>, vector<8x32xf32>
    %c0_1 = arith.constant 0 : index
    %c0_2 = arith.constant 0 : index
    %1 = vector.load %arg2[%c0_1, %c0_2] : memref<32x128xf32, #tpu.memory_space<vmem>>, vector<32x128xf32>
    %cst = arith.constant dense<0.000000e+00> : vector<8x128xf32>
    %2 = tpu.matmul %0, %1, %cst {dimension_numbers = #tpu.dot_dimension_numbers<[1], [0], [0], [1], [0, 0, 1, 1], [], []>} : vector<8x32xf32>, vector<32x128xf32>, vector<8x128xf32> -> vector<8x128xf32>
    %c0_3 = arith.constant 0 : index
    %c0_4 = arith.constant 0 : index
    %3 = vector.load %arg3[%c0_3, %c0_4] : memref<1x128xf32, #tpu.memory_space<vmem>>, vector<1x128xf32>
    %4 = vector.broadcast %3 : vector<1x128xf32> to vector<8x128xf32>
    %5 = arith.addf %2, %4 : vector<8x128xf32>
    %cst_5 = arith.constant 5.000000e-01 : f32
    %6 = vector.broadcast %cst_5 : f32 to vector<8x128xf32>
    %7 = arith.mulf %6, %5 : vector<8x128xf32>
    %cst_6 = arith.constant 0.707106769 : f32
    %8 = vector.broadcast %cst_6 : f32 to vector<8x128xf32>
    %9 = arith.mulf %5, %8 : vector<8x128xf32>
    %10 = math.absf %9 : vector<8x128xf32>
    %cst_7 = arith.constant 0.327591091 : f32
    %11 = vector.broadcast %cst_7 : f32 to vector<8x128xf32>
    %12 = arith.mulf %11, %10 : vector<8x128xf32>
    %cst_8 = arith.constant 1.000000e+00 : f32
    %13 = vector.broadcast %cst_8 : f32 to vector<8x128xf32>
    %14 = arith.addf %13, %12 : vector<8x128xf32>
    %cst_9 = arith.constant 1.000000e+00 : f32
    %15 = vector.broadcast %cst_9 : f32 to vector<8x128xf32>
    %16 = arith.divf %15, %14 : vector<8x128xf32>
    %cst_10 = arith.constant 1.06140542 : f32
    %17 = vector.broadcast %cst_10 : f32 to vector<8x128xf32>
    %18 = arith.mulf %17, %16 : vector<8x128xf32>
    %cst_11 = arith.constant -1.45315206 : f32
    %19 = vector.broadcast %cst_11 : f32 to vector<8x128xf32>
    %20 = arith.addf %18, %19 : vector<8x128xf32>
    %21 = arith.mulf %20, %16 : vector<8x128xf32>
    %cst_12 = arith.constant 1.42141378 : f32
    %22 = vector.broadcast %cst_12 : f32 to vector<8x128xf32>
    %23 = arith.addf %21, %22 : vector<8x128xf32>
    %24 = arith.mulf %23, %16 : vector<8x128xf32>
    %cst_13 = arith.constant -0.284496725 : f32
    %25 = vector.broadcast %cst_13 : f32 to vector<8x128xf32>
    %26 = arith.addf %24, %25 : vector<8x128xf32>
    %27 = arith.mulf %26, %16 : vector<8x128xf32>
    %cst_14 = arith.constant 0.254829586 : f32
    %28 = vector.broadcast %cst_14 : f32 to vector<8x128xf32>
    %29 = arith.addf %27, %28 : vector<8x128xf32>
    %30 = arith.mulf %29, %16 : vector<8x128xf32>
    %cst_15 = arith.constant 0.000000e+00 : f32
    %31 = vector.broadcast %cst_15 : f32 to vector<8x128xf32>
    %32 = arith.subf %31, %10 : vector<8x128xf32>
    %33 = arith.mulf %32, %10 : vector<8x128xf32>
    %34 = math.exp %33 : vector<8x128xf32>
    %35 = arith.mulf %30, %34 : vector<8x128xf32>
    %cst_16 = arith.constant 1.000000e+00 : f32
    %36 = vector.broadcast %cst_16 : f32 to vector<8x128xf32>
    %37 = arith.subf %36, %35 : vector<8x128xf32>
    %cst_17 = arith.constant 0.000000e+00 : f32
    %38 = vector.broadcast %cst_17 : f32 to vector<8x128xf32>
    %39 = arith.cmpf oge, %9, %38 : vector<8x128xf32>
    %cst_18 = arith.constant 0.000000e+00 : f32
    %40 = vector.broadcast %cst_18 : f32 to vector<8x128xf32>
    %41 = arith.subf %40, %37 : vector<8x128xf32>
    %42 = arith.select %39, %37, %41 : vector<8x128xi1>, vector<8x128xf32>
    %cst_19 = arith.constant 1.000000e+00 : f32
    %43 = vector.broadcast %cst_19 : f32 to vector<8x128xf32>
    %44 = arith.addf %43, %42 : vector<8x128xf32>
    %45 = arith.mulf %7, %44 : vector<8x128xf32>
    %c0_20 = arith.constant 0 : index
    %c0_21 = arith.constant 0 : index
    %46 = vector.load %arg4[%c0_20, %c0_21] : memref<128x128xf32, #tpu.memory_space<vmem>>, vector<128x128xf32>
    %cst_22 = arith.constant dense<0.000000e+00> : vector<8x128xf32>
    %47 = tpu.matmul %45, %46, %cst_22 {dimension_numbers = #tpu.dot_dimension_numbers<[1], [0], [0], [1], [0, 0, 1, 1], [], []>} : vector<8x128xf32>, vector<128x128xf32>, vector<8x128xf32> -> vector<8x128xf32>
    %c0_23 = arith.constant 0 : index
    %c0_24 = arith.constant 0 : index
    %48 = vector.load %arg5[%c0_23, %c0_24] : memref<1x128xf32, #tpu.memory_space<vmem>>, vector<1x128xf32>
    %49 = vector.broadcast %48 : vector<1x128xf32> to vector<8x128xf32>
    %50 = arith.addf %47, %49 : vector<8x128xf32>
    %c0_25 = arith.constant 0 : index
    %c0_26 = arith.constant 0 : index
    %51 = vector.load %arg6[%c0_25, %c0_26] : memref<8x128xf32, #tpu.memory_space<vmem>>, vector<8x128xf32>
    tpu.vector_store %arg6[%c0_25, %c0_26], %50 {strides = array<i32>} : memref<8x128xf32, #tpu.memory_space<vmem>>, vector<8x128xf32>,
    return
  }
  func.func @transform_0(%arg0: i32) -> (i32, i32) {
    %c0_i32 = arith.constant 0 : i32
    %c0_i32_0 = arith.constant 0 : i32
    return %arg0, %c0_i32 : i32, i32
  }
  func.func @transform_1(%arg0: i32) -> (i32, i32) {
    %c0_i32 = arith.constant 0 : i32
    %c0_i32_0 = arith.constant 0 : i32
    %c0_i32_1 = arith.constant 0 : i32
    return %c0_i32, %c0_i32_0 : i32, i32
  }
  func.func @transform_2(%arg0: i32) -> (i32, i32) {
    %c0_i32 = arith.constant 0 : i32
    %c0_i32_0 = arith.constant 0 : i32
    %c0_i32_1 = arith.constant 0 : i32
    return %c0_i32, %c0_i32_0 : i32, i32
  }
  func.func @transform_3(%arg0: i32) -> (i32, i32) {
    %c0_i32 = arith.constant 0 : i32
    %c0_i32_0 = arith.constant 0 : i32
    %c0_i32_1 = arith.constant 0 : i32
    return %c0_i32, %c0_i32_0 : i32, i32
  }
  func.func @transform_4(%arg0: i32) -> (i32, i32) {
    %c0_i32 = arith.constant 0 : i32
    %c0_i32_0 = arith.constant 0 : i32
    %c0_i32_1 = arith.constant 0 : i32
    return %c0_i32, %c0_i32_0 : i32, i32
  }
  func.func @transform_5(%arg0: i32) -> (i32, i32) {
    %c0_i32 = arith.constant 0 : i32
    %c0_i32_0 = arith.constant 0 : i32
    return %arg0, %c0_i32 : i32, i32
  }
}

</mosaic_0001>

<bundles_post_ra>
// kernel: tpu_custom_call.1
= control target key start
LH: loop header
LB: loop body
LE: loop exit
PB: predicated region body
PF: predicated region fallthrough
CT: control target
= control target key end

     0   :  { %10 = vsyncpa [#allocation3], 0  ;;  %s1208_s0 = inlined_call_operand.hbm [shape: f32[16,32], index: 0, kind: input, shape index: {}]   ;;  %s1209_s1 = inlined_call_operand.hbm [shape: f32[32,128], index: 1, kind: input, shape index: {}]   ;;  %s1210_s2 = inlined_call_operand.vmem [shape: f32[1,128], index: 2, kind: input, shape index: {}]   ;;  %s1211_s3 = inlined_call_operand.hbm [shape: f32[128,128], index: 3, kind: input, shape index: {}]   ;;  %s1212_s4 = inlined_call_operand.vmem [shape: f32[1,128], index: 4, kind: input, shape index: {}]   ;;  %s1213_s5 = inlined_call_operand.hbm [shape: f32[16,128], index: 5, kind: output, shape index: {}]  }
   0x1   :  { %12 = vsyncpa [#allocation3 + $0x1], 0 }
   0x2   :  { %13 = vsyncpa [#allocation6], 0 }
   0x3   :  { %14 = vsyncpa [#allocation4], 0 }
   0x4   :  { %16 = vsyncpa [#allocation4 + $0x1], 0  ;;  %s969_s18 = smov 0   ;;  %s971_s19 = smov 0  }
   0x5   :  { %s973_s20 = smov 0   ;;  %s975_s21 = smov 0  }
   0x6 LB: > { %s990_s22 = sadd.s32 4294967295, %s928_s21   ;;  %s579_s23 = sadd.s32 4294967294, %s928_s21   ;;  %s928_s21 = sphi %s975_s21, %s1233_s21   ;;  %s924_s20 = sphi %s973_s20, %s1232_s20   ;;  %s920_s19 = sphi %s971_s19, %s1231_s19   ;;  %s916_s18 = sphi %s969_s18, %s1230_s18  }
   0x7   : > { %p42_p0 = scmp.ne.s32.totalorder %s920_s19, %s916_s18  ;;  %p1214_p1 = scmp.eq.s32.totalorder %s990_s22, 0 }
   0x8   : > { %p156_p3 = scmp.eq.s32.totalorder %s579_s23, 1  ;;  %p580_p5 = scmp.ge.s32.totalorder %s928_s21, 1 }
   0x9   : > { %p999_p4 = por %p1214_p1, %p42_p0  ;;  %p163_p7 = scmp.lt.s32.totalorder %s928_s21, 3 }
   0xa   : > { %p1004_p6 = por %p156_p3, %p42_p0  ;;  %s930_s27 = smov [#allocation5]  }
   0xb   : > { %s1217_s24 = scalar_select %p999_p4, 1, 0 }
   0xc   : > { %s1218_s25 = scalar_select %p1004_p6, 1, 0 }
   0xd   : > { %p1009_p8 = pnand %p580_p5, %p163_p7  ;;  %s175_s28 = sshll.u32 %s930_s27, 4  ;;  %s1013_s28 = int_to_ptr.vmem [resolvable:$true] %s175_s28 }
   0xe   : > { %s931_s30 = smov [#allocation7]   ;;  %s772_s9 = scalar_lea.hbm %s1209_s1, 512 }
   0xf   : > { %p708_p9 = pneg %p1009_p8  ;;  %s191_s6 = sshll.u32 %s931_s30, 4  ;;  %s1024_s6 = int_to_ptr.vmem [resolvable:$true] %s191_s6 }
  0x10   : > { %p773_p12 = scmp.ne.s32.totalorder %s1209_s1, %s772_s9  ;;  %p779_p5 = scmp.lt.u32.totalorder %s772_s9, %s1209_s1 }
  0x11   : > { %p1020_p11 = pnand %p708_p9, %p1214_p1 }
  0x13   : > { %p774_p13 = pneg %p1020_p11 }
  0x15   : > { %p775_p0 = pnand %p774_p13, %p773_p12 }
  0x17   : > { %p776_p3 = pneg %p775_p0 }
  0x19   : > { %p781_p7 = pnand %p779_p5, %p776_p3 }
  0x1b   : > { %784 = shalt.err (!%p781_p7)
}
  0x1c   : > { %s785_s14 = scalar_lea.vmem %s1013_s28, 512  ;;  %p793_p2 = scmp.lt.s32.totalorder %s1013_s28, %s1013_s28 }
  0x1d   : > { %p786_p9 = scmp.ne.s32.totalorder %s1013_s28, %s785_s14  ;;  %p794_p12 = scmp.lt.s32.totalorder %s785_s14, %s785_s14 }
  0x1f   : > { %p788_p10 = pnand %p786_p9, %p774_p13  ;;  %p795_p0 = por %p794_p12, %p793_p2 }
  0x21   : > { %p789_p1 = pneg %p788_p10 }
  0x23   : > { %p796_p6 = pnand %p795_p0, %p789_p1 }
  0x25   : > { %799 = shalt.err (!%p796_p6)
}
  0x26   : > { %s932_s15 = smov 128   ;;  %s933_s16 = smov 8  }
  0x27   : > { %711 = dma.hbm_to_vmem [thread:$0]  (!%p1020_p11), %s1209_s1, 512, %s1013_s28, [#allocation6], %s932_s15, %s932_s15, %s933_s16  }
  0x28   : > { %s800_s7 = scalar_lea.hbm %s1211_s3, 2048 }
  0x29   : > { %p801_p2 = scmp.ne.s32.totalorder %s1211_s3, %s800_s7  ;;  %p807_p10 = scmp.lt.u32.totalorder %s800_s7, %s1211_s3 }
  0x2b   : > { %p803_p1 = pnand %p801_p2, %p774_p13 }
  0x2d   : > { %p804_p6 = pneg %p803_p1 }
  0x2f   : > { %p809_p3 = pnand %p807_p10, %p804_p6 }
  0x31   : > { %812 = shalt.err (!%p809_p3)
}
  0x32   : > { %s813_s28 = scalar_lea.vmem %s1024_s6, 2048  ;;  %p821_p12 = scmp.lt.s32.totalorder %s1024_s6, %s1024_s6 }
  0x33   : > { %p814_p5 = scmp.ne.s32.totalorder %s1024_s6, %s813_s28  ;;  %p822_p0 = scmp.lt.s32.totalorder %s813_s28, %s813_s28 }
  0x35   : > { %p816_p7 = pnand %p814_p5, %p774_p13  ;;  %p823_p2 = por %p822_p0, %p821_p12 }
  0x37   : > { %p817_p9 = pneg %p816_p7 }
  0x39   : > { %p824_p1 = pnand %p823_p2, %p817_p9 }
  0x3b   : > { %827 = shalt.err (!%p824_p1)
}
  0x3c   : > { %714 = dma.hbm_to_vmem [thread:$0]  (!%p1020_p11), %s1211_s3, 2048, %s1024_s6, [#allocation6], %s932_s15, %s932_s15, %s933_s16  }
  0x3d   : > { %s1079_s14 = sadd.s32 1, %s928_s21   ;;  %s29_s29 = sadd.s32 1, %s924_s20 }
  0x3e   : > { %s26_s17 = ssub.s32 %s928_s21, %s1079_s14  ;;  %p36_p13 = scmp.ne.s32.totalorder %s924_s20, %s920_s19 }
  0x3f   : > { %p27_p6 = scmp.eq.s32.totalorder %s26_s17, 0  ;;  %p37_p10 = scmp.eq.s32.totalorder %s928_s21, 0 }
  0x40   : > { %p1221_p3 = scmp.eq.s32.totalorder %s990_s22, 1  ;;  %p725_p7 = scmp.lt.s32.totalorder %s928_s21, 2 }
  0x41   : > { %s1095_s27 = scalar_select %p27_p6, %s924_s20, %s29_s29  }
  0x42   : > { %p1089_p5 = por %p1221_p3, %p36_p13  ;;  %p38_p9 = por %p37_p10, %p36_p13 }
  0x43   : > { %s208_s30 = sand.u32 1, %s924_s20   ;;  %s585_s6 = sshll.u32 %s928_s21, 7 }
  0x44   : > { %s1222_s23 = scalar_select %p1089_p5, 1, 0 }
  0x45   : > { %s584_s7 = sshll.u32 %s208_s30, 3  ;;  %s1102_s8 = scalar_lea.hbm %s1208_s0, %s585_s6 }
  0x46   : > { %s212_s9 = scalar_lea.vmem [#allocation2], %s584_s7  ;;  %p1106_p11 = pnand %p725_p7, %p38_p9 }
  0x47   : > { %s219_s10 = sshll.u32 %s212_s9, 4  ;;  %s209_s28 = scalar_lea.sflag [#allocation3], %s208_s30  ;;  %s1104_s10 = int_to_ptr.vmem [resolvable:$true] %s219_s10 }
  0x48   : > { %s828_s12 = scalar_lea.hbm %s1102_s8, 128  ;;  %p830_p0 = pneg %p1106_p11 }
  0x49   : > { %p829_p12 = scmp.ne.s32.totalorder %s1102_s8, %s828_s12  ;;  %s833_s17 = scalar_lea.hbm %s1208_s0, 256 }
  0x4a   : > { %p834_p13 = scmp.lt.u32.totalorder %s1102_s8, %s1208_s0  ;;  %p835_p6 = scmp.lt.u32.totalorder %s833_s17, %s828_s12 }
  0x4b   : > { %p831_p2 = pnand %p830_p0, %p829_p12  ;;  %p837_p3 = scmp.lt.u32.totalorder %s828_s12, %s1102_s8 }
  0x4c   : > { %p836_p10 = por %p835_p6, %p834_p13 }
  0x4d   : > { %p832_p1 = pneg %p831_p2 }
  0x4e   : > { %p838_p7 = por %p837_p3, %p836_p10 }
  0x50   : > { %p839_p9 = pnand %p838_p7, %p832_p1 }
  0x52   : > { %842 = shalt.err (!%p839_p9)
}
  0x53   : > { %s843_s30 = scalar_lea.vmem %s1104_s10, 128  ;;  %s934_s15 = smov [#allocation2]  }
  0x54   : > { %p844_p12 = scmp.ne.s32.totalorder %s1104_s10, %s843_s30  ;;  %s848_s16 = sshll.u32 %s934_s15, 4  ;;  %s849_s16 = int_to_ptr.vmem [resolvable:$false] %s848_s16 }
  0x55   : > { %s850_s9 = scalar_lea.vmem %s849_s16, 256  ;;  %p851_p4 = scmp.lt.s32.totalorder %s1104_s10, %s849_s16 }
  0x56   : > { %p846_p2 = pnand %p844_p12, %p830_p0  ;;  %p852_p13 = scmp.lt.s32.totalorder %s850_s9, %s843_s30 }
  0x58   : > { %p847_p5 = pneg %p846_p2  ;;  %p853_p6 = por %p852_p13, %p851_p4 }
  0x5a   : > { %p854_p10 = pnand %p853_p6, %p847_p5 }
  0x5c   : > { %857 = shalt.err (!%p854_p10)
}
  0x5d   : > { %718 = dma.hbm_to_vmem [thread:$0]  (!%p1106_p11), %s1102_s8, 128, %s1104_s10, %s209_s28  }
  0x5e   : > { %228 = sbr.rel (%p1009_p8) target bundleno = 605 (0x25d), region = 40  ;;  %s1138_s12 = sand.u32 (!%p1009_p8), 1, %s920_s19  }
  0x5f   : > { %s587_s13 = sshll.u32 (!%p1009_p8), %s1138_s12, 3  ;;  %s231_s29 = scalar_lea.sflag (!%p1009_p8), [#allocation3], %s1138_s12 }
  0x60   : > { %s234_s17 = scalar_lea.vmem (!%p1009_p8), [#allocation2], %s587_s13  ;;  %p1224_p4 = scmp.ne.s32.totalorder (!%p1009_p8), %s1217_s24, 0 }
  0x65   : > { %903 = dma.done.wait (%p1224_p4), %s231_s29, 128  }
  0x66   : > { %905 = vsyncadd (%p1224_p4), %s231_s29, 4294967168  ;;  %p1225_p5 = scmp.eq.s32.totalorder %s990_s22, 0 }
  0x68   : > { %907 = dma.done.wait (%p1225_p5), [#allocation6], 2560   ;;  %p1226_p8 = pmov %p1225_p5 }
  0x69   : > { %v935_v0 = vmov 0.0|0.0   ;;  %vm936_vm0 = vmmov 0   ;;  %v937_v1 = vmov 0.0   ;;  %v270_v2 = vld [vmem:[#allocation5] sm:$0xff]  ;;  %v271_v3 = vld [vmem:[#allocation5 + $0x8] sm:$0xff]  ;;  %v272_v4 = vld [vmem:[#allocation5 + $0x10] sm:$0xff] }
  0x6a   : > { %909 = vsyncadd (%p1226_p8), [#allocation6], 4294964736  ;;  %666 = vmatprep.subr.bf16.mxu0 %v935_v0  ;;  %628 = vmatprep.mubr.msk.f32.mxu0 %vm936_vm0, %v937_v1  ;;  %v667_v5 = vpack.c.bf16 %v271_v3, %v270_v2  ;;  %v273_v6 = vld [vmem:[#allocation5 + $0x18] sm:$0xff]  ;;  %vm281_vm1 = vcmask 261120   ;;  %v382_v9 = vld [vmem:[#allocation7] sm:$0xff]  ;;  %s595_s11 = sshll.u32 %s990_s22, 7 }
  0x6b   : > { %672 = vmatprep.subr.bf16.mxu1 %v935_v0  ;;  %663 = vmatprep.mubr.msk.f32.mxu1 %vm936_vm0, %v937_v1  ;;  %v670_v7 = vpack.c.bf16 %v273_v6, %v272_v4  ;;  %v269_v8 = vld [vmem:[%s234_s17] sm:$0xff]  ;;  %v383_v10 = vld [vmem:[#allocation7 + $0x8] sm:$0xff]  ;;  %v386_v15 = vld [vmem:[#allocation7 + $0x20] sm:$0xff]  ;;  %s268_s28 = scalar_lea.vmem [#allocation8], %s587_s13  ;;  %s1164_s15 = scalar_lea.hbm %s1213_s5, %s595_s11 }
  0x6c   : > { %668 = vmatpush3.bf16.msra.mxu0 %v667_v5  ;;  %v384_v11 = vld [vmem:[#allocation7 + $0x10] sm:$0xff]  ;;  %v673_v12 = vpack.c.bf16 %v383_v10, %v382_v9  ;;  %v385_v13 = vld [vmem:[#allocation7 + $0x18] sm:$0xff]  ;;  %v387_v16 = vld [vmem:[#allocation7 + $0x28] sm:$0xff]  ;;  %s490_s7 = sshll.u32 %s268_s28, 4  ;;  %s477_s16 = scalar_lea.sflag [#allocation4], %s1138_s12  ;;  %s1166_s7 = int_to_ptr.vmem [resolvable:$true] %s490_s7 }
  0x6d   : > { %669 = vmatprep.subr.bf16.mxu0 %v935_v0  ;;  %v676_v14 = vpack.c.bf16 %v385_v13, %v384_v11  ;;  %v679_v17 = vpack.c.bf16 %v387_v16, %v386_v15  ;;  %v388_v18 = vld [vmem:[#allocation7 + $0x30] sm:$0xff]  ;;  %v389_v19 = vld [vmem:[#allocation7 + $0x38] sm:$0xff]  ;;  %v390_v21 = vld [vmem:[#allocation7 + $0x40] sm:$0xff]  ;;  %s858_s9 = scalar_lea.vmem %s1166_s7, 128  ;;  %p1227_p0 = scmp.ne.s32.totalorder %s1222_s23, 0 }
  0x6e   : > { %674 = vmatpush3.bf16.msra.mxu1 %v673_v12  ;;  %v682_v20 = vpack.c.bf16 %v389_v19, %v388_v18  ;;  %v391_v22 = vld [vmem:[#allocation7 + $0x48] sm:$0xff]  ;;  %v392_v24 = vld [vmem:[#allocation7 + $0x50] sm:$0xff]  ;;  %v393_v25 = vld [vmem:[#allocation7 + $0x58] sm:$0xff]  ;;  %p859_p11 = scmp.ne.s32.totalorder %s1166_s7, %s858_s9  ;;  %s938_s22 = smov [#allocation8]  }
  0x6f   : > { %675 = vmatprep.subr.bf16.mxu1 %v935_v0  ;;  %v685_v23 = vpack.c.bf16 %v391_v22, %v390_v21  ;;  %v688_v26 = vpack.c.bf16 %v393_v25, %v392_v24  ;;  %v394_v27 = vld [vmem:[#allocation7 + $0x60] sm:$0xff]  ;;  %v395_v28 = vld [vmem:[#allocation7 + $0x68] sm:$0xff]  ;;  %v396_v30 = vld [vmem:[#allocation7 + $0x70] sm:$0xff]  ;;  %s862_s13 = sshll.u32 %s938_s22, 4  ;;  %s863_s13 = int_to_ptr.vmem [resolvable:$false] %s862_s13 }
  0x70   : > { %671 = vmatpush3.bf16.msra.mxu0 %v670_v7  ;;  %v691_v29 = vpack.c.bf16 %v395_v28, %v394_v27  ;;  %v397_v31 = vld [vmem:[#allocation7 + $0x78] sm:$0xff]  ;;  %v591_v33 = vld [vmem:[%s1210_s2] ss:$0 sm:$0xff]  ;;  %p860_p1 = pnand %p859_p11, %p1227_p0  ;;  %s864_s29 = scalar_lea.vmem %s863_s13, 256 }
  0x71   : > { %v694_v32 = vpack.c.bf16 %v397_v31, %v396_v30  ;;  %v593_v62 = vld [vmem:[%s1212_s4] ss:$0 sm:$0xff]  ;;  %p865_p7 = scmp.lt.s32.totalorder %s1166_s7, %s863_s13  ;;  %p866_p9 = scmp.lt.s32.totalorder %s864_s29, %s858_s9 }
  0x72   : > { %677 = vmatpush3.bf16.msra.mxu1 %v676_v14  ;;  %p861_p3 = pneg %p860_p1 }
  0x73   : > { %629 = vmatmul.mubr.msk.f32.vlgmr.msra.gmra.mrb[0].mxu0 %vm281_vm1, %v269_v8  ;;  %678 = vmatprep.subr.bf16.mxu1 %v935_v0  ;;  %p867_p12 = por %p866_p9, %p865_p7 }
  0x75   : > { %p868_p2 = pnand %p867_p12, %p861_p3 }
  0x76   : > { %680 = vmatpush3.bf16.msra.mxu1 %v679_v17 }
  0x77   : > { %681 = vmatprep.subr.bf16.mxu1 %v935_v0 }
  0x7a   : > { %683 = vmatpush3.bf16.msra.mxu1 %v682_v20 }
  0x7b   : > { %684 = vmatprep.subr.bf16.mxu1 %v935_v0 }
  0x7e   : > { %686 = vmatpush3.bf16.msra.mxu1 %v685_v23 }
  0x7f   : > { %687 = vmatprep.subr.bf16.mxu1 %v935_v0 }
  0x82   : > { %689 = vmatpush3.bf16.msra.mxu1 %v688_v26 }
  0x83   : > { %690 = vmatprep.subr.bf16.mxu1 %v935_v0 }
  0x86   : > { %692 = vmatpush3.bf16.msra.mxu1 %v691_v29 }
  0x87   : > { %693 = vmatprep.subr.bf16.mxu1 %v935_v0 }
  0x8a   : > { %695 = vmatpush3.bf16.msra.mxu1 %v694_v32 }
 0x146   : > { %v351_v34 = vpop.f32.mrb[0].mxu0 }
 0x147   : > { %v352_v35 = vadd.f32 %v591_v33, %v351_v34  ;;  %v630_v36 = vpop.f32.mrb[1].mxu0 }
 0x149   : > { %v356_v37 = vmul.f32 0.70710677, %v352_v35  ;;  %v355_v59 = vmul.f32 0.5, %v352_v35 }
 0x14b   : > { %v357_v38 = vand.u32 2147483647, %v356_v37  ;;  %vm377_vm2 = vcmp.ge.f32.partialorder %v356_v37, 0.0 }
 0x14d   : > { %v358_v39 = vmul.f32 0.3275911, %v357_v38  ;;  %v371_v41 = vsub.f32 0.0, %v357_v38 }
 0x14f   : > { %v359_v40 = vadd.f32 1.0, %v358_v39  ;;  %v372_v43 = vmul.f32 %v371_v41, %v357_v38 }
 0x151   : > { %768 = vrcp.f32 %v359_v40  ;;  %v373_v46 = vmul.f32 1.442695, %v372_v43 }
 0x153   : > { %770 = vpow2.f32 %v373_v46 }
 0x15b   : > { %v769_v42 = vpop.eup %768 }
 0x15c   : > { %v362_v44 = vmul.f32 1.0614054, %v769_v42 }
 0x15d   : > { %v771_v54 = vpop.eup %770 }
 0x15e   : > { %v363_v45 = vadd.f32 -1.4531521, %v362_v44 }
 0x160   : > { %v364_v47 = vmul.f32 %v769_v42, %v363_v45 }
 0x162   : > { %v365_v48 = vadd.f32 1.4214138, %v364_v47 }
 0x164   : > { %v366_v49 = vmul.f32 %v769_v42, %v365_v48 }
 0x166   : > { %v367_v50 = vadd.f32 -0.28449672, %v366_v49 }
 0x168   : > { %v368_v51 = vmul.f32 %v769_v42, %v367_v50 }
 0x16a   : > { %v369_v52 = vadd.f32 0.2548296, %v368_v51 }
 0x16c   : > { %v370_v53 = vmul.f32 %v769_v42, %v369_v52 }
 0x16e   : > { %v375_v55 = vmul.f32 %v771_v54, %v370_v53 }
 0x170   : > { %v376_v56 = vsub.f32 1.0, %v375_v55 }
 0x172   : > { %v378_v57 = vsub.f32 0.0, %v376_v56 }
 0x174   : > { %v379_v58 = vsel %vm377_vm2, %v376_v56, %v378_v57 }
 0x175   : > { %v380_v60 = vadd.f32 1.0, %v379_v58 }
 0x177   : > { %v381_v61 = vmul.f32 %v380_v60, %v355_v59 }
 0x179   : > { %664 = vmatmul.mubr.f32.vlgmr.msra.gmra.mrb[0].mxu1 %v381_v61 }
 0x24c   : > { %v471_v63 = vpop.f32.mrb[0].mxu1 }
 0x24d   : > { %v472_v0 = vadd.f32 %v593_v62, %v471_v63  ;;  %v665_v1 = vpop.f32.mrb[1].mxu1 }
 0x24f   : > { %475 = vst [vmem:[%s268_s28] sm:$0xff] %v472_v0 }
 0x250   : > { %871 = shalt.err (!%p868_p2)
}
 0x251   : > { %s872_s12 = scalar_lea.hbm %s1164_s15, 128  ;;  %s876_s26 = scalar_lea.hbm %s1213_s5, 256 }
 0x252   : > { %p873_p13 = scmp.ne.s32.totalorder %s1164_s15, %s872_s12  ;;  %p877_p4 = scmp.lt.u32.totalorder %s1164_s15, %s1213_s5 }
 0x253   : > { %p878_p5 = scmp.lt.u32.totalorder %s876_s26, %s872_s12  ;;  %p880_p11 = scmp.lt.u32.totalorder %s872_s12, %s1164_s15 }
 0x254   : > { %p874_p6 = pnand %p873_p13, %p1227_p0 }
 0x255   : > { %p879_p8 = por %p878_p5, %p877_p4 }
 0x256   : > { %p875_p10 = pneg %p874_p6 }
 0x257   : > { %p881_p1 = por %p880_p11, %p879_p8 }
 0x259   : > { %p882_p3 = pnand %p881_p1, %p875_p10 }
 0x25b   : > { %885 = shalt.err (!%p882_p3)
}
 0x25c   : > { %706 = dma.vmem_to_hbm [thread:$0]  (%p1227_p0), %s1166_s7, 128, %s1164_s15, %s477_s16  }
 0x25d PF: > { %s502_s11 = sand.u32 1, %s916_s18   ;;  %p1228_p7 = scmp.ne.s32.totalorder %s1218_s25, 0 }
 0x25e   : > { %p1229_p9 = scmp.ge.s32.totalorder %s928_s21, 2  ;;  %s503_s28 = scalar_lea.sflag [#allocation4], %s502_s11 }
 0x260   : > { %p720_p12 = pnand %p1229_p9, %p1228_p7 }
 0x262   : > { %911 = dma.done.wait (!%p720_p12), %s503_s28, 128  }
 0x263   : > { %913 = vsyncadd (!%p720_p12), %s503_s28, 4294967168  ;;  %p19_p2 = scmp.ge.s32.totalorder %s1079_s14, 4   ;;  %s1230_s18 = smov %s920_s19 }
 0x264   : > { %s1231_s19 = smov %s924_s20  ;;  %s1232_s20 = smov %s1095_s27 }
 0x265   : > { %s1233_s21 = smov %s1079_s14  ;;  %21 = sbr.rel (!%p19_p2) target bundleno = 6 (0x6), region = 93 }
 0x26c   :  { %508 = vsyncpa [#allocation3], 1 }
 0x26d   :  { %510 = vsyncpa [#allocation3 + $0x1], 1 }
 0x26e   :  { %511 = vsyncpa [#allocation6], 1 }
 0x26f   :  { %512 = vsyncpa [#allocation4], 1 }
 0x270   :  { %514 = vsyncpa [#allocation4 + $0x1], 1 }

</bundles_post_ra>
